<compile_context>
chip_gen: v7x
topology: tpu7x:2x2x1
jax: 0.10.0
libtpu: 0.0.40
codegen_flags: <defaults>
</compile_context>

<pallas_src>
import jax
import jax.numpy as jnp
from jax import lax
from jax.experimental import pallas as pl
from jax.experimental.pallas import tpu as pltpu

SMOOTH = 1e-5


def _soft_dice_kernel(pred_ref, gt_ref, out_ref, inter_acc, psum_acc, gsum_acc):
    # One grid step = (sample n, HW tile h).
    #   pred_ref: (1, C, T)  logits for sample n, all classes, HW tile h
    #   gt_ref:   (1, 1, T)  float class labels for sample n, HW tile h
    #   out_ref:  (1, C, 1)  per-(sample, class) dice, written at last HW tile
    #   *_acc:    (C, 1)     VMEM partial sums, resident across the HW axis
    h = pl.program_id(1)

    @pl.when(h == 0)
    def _init():
        inter_acc[...] = jnp.zeros_like(inter_acc)
        psum_acc[...] = jnp.zeros_like(psum_acc)
        gsum_acc[...] = jnp.zeros_like(gsum_acc)

    logits = pred_ref[0]                                   # (C, T)
    pred = jax.nn.sigmoid(logits.astype(jnp.float32))      # EUP
    C, T = logits.shape

    labels = jnp.broadcast_to(gt_ref[0], (C, T))           # (C, T)
    cls = lax.broadcasted_iota(jnp.int32, (C, T), 0).astype(jnp.float32)
    onehot = (labels == cls).astype(jnp.float32)           # one-hot over classes

    inter_acc[...] += jnp.sum(pred * onehot, axis=1, keepdims=True)   # (C, 1)
    psum_acc[...] += jnp.sum(pred, axis=1, keepdims=True)             # (C, 1)
    gsum_acc[...] += jnp.sum(onehot, axis=1, keepdims=True)           # (C, 1)

    @pl.when(h == pl.num_programs(1) - 1)
    def _finalize():
        dice = ((2.0 * inter_acc[...] + SMOOTH)
                / (psum_acc[...] + gsum_acc[...] + SMOOTH))           # (C, 1)
        out_ref[0] = dice


def _pick_hw_tile(hw, c, budget_bytes=4 << 20):
    """Largest multiple-of-128 divisor of HW keeping C*T*4B under ~4 MiB."""
    if hw % 128 != 0:
        return hw  # fall back to a single full block (block rule: last dim == full dim)
    max_elems = max(128, budget_bytes // (4 * max(c, 1)))
    best = 128
    for t in range(128, hw + 1, 128):
        if hw % t == 0 and t <= max_elems:
            best = t
    return best


def soft_dice_loss(y_pred, y_true, *, hw_tile=None):
    """Pallas implementation of SoftDiceLoss.forward (activation='sigmoid')."""
    N, C, H, W = y_pred.shape
    HW = H * W

    # Free (contiguous) reshapes only — no XLA transpose of y_pred.
    pred = y_pred.reshape(N, C, HW)
    gt = y_true.astype(jnp.float32).reshape(N, 1, HW)

    if hw_tile is None:
        hw_tile = _pick_hw_tile(HW, C)
    assert HW % hw_tile == 0, (HW, hw_tile)
    n_hw = HW // hw_tile

    dice_nc = pl.pallas_call(
        _soft_dice_kernel,
        out_shape=jax.ShapeDtypeStruct((N, C, 1), jnp.float32),
        grid_spec=pltpu.PrefetchScalarGridSpec(
            num_scalar_prefetch=0,
            grid=(N, n_hw),                       # HW tiles innermost (reduction)
            in_specs=[
                pl.BlockSpec((1, C, hw_tile), lambda n, h: (n, 0, h)),
                pl.BlockSpec((1, 1, hw_tile), lambda n, h: (n, 0, h)),
            ],
            out_specs=pl.BlockSpec((1, C, 1), lambda n, h: (n, 0, 0)),
            scratch_shapes=[pltpu.VMEM((C, 1), jnp.float32)] * 3,
        ),
        compiler_params=pltpu.CompilerParams(
            dimension_semantics=("parallel", "arbitrary"),
            vmem_limit_bytes=32 << 20,
        ),
    )(pred, gt)

    # Reference: mean over classes of (batch-mean dice) == mean over (n, c).
    return 1.0 - jnp.mean(dice_nc)


def soft_dice_loss_ref(y_pred, y_true):
    """Pure-JAX reference mirroring the PyTorch module exactly."""
    N, C, H, W = y_pred.shape
    pred = jax.nn.sigmoid(y_pred.astype(jnp.float32))
    dices = []
    for i in range(C):
        p = pred[:, i].reshape(N, -1)
        g = (y_true.astype(jnp.float32) == float(i)).astype(jnp.float32).reshape(N, -1)
        inter = jnp.sum(p * g, axis=1)
        union = jnp.sum(p, axis=1) + jnp.sum(g, axis=1)
        d = (2.0 * inter + SMOOTH) / (union + SMOOTH)
        dices.append(jnp.sum(d) / N)
    return 1.0 - sum(dices) / len(dices)


if __name__ == "__main__":
    key = jax.random.PRNGKey(0)
    k1, k2 = jax.random.split(key)

    N, C, H, W = 2, 4, 16, 16
    y_pred = jax.random.normal(k1, (N, C, H, W), dtype=jnp.float32)
    y_true = jax.random.randint(k2, (N, H, W), 0, C).astype(jnp.float32)

    # hw_tile=128 -> 2 HW tiles, exercises the tiled-reduction (init/finalize) path.
    loss = soft_dice_loss(y_pred, y_true, hw_tile=128)
    loss = jax.block_until_ready(loss)

    # Auto tile-size path (single tile at this toy size).
    loss_auto = jax.block_until_ready(soft_dice_loss(y_pred, y_true))

    ref = jax.block_until_ready(soft_dice_loss_ref(y_pred, y_true))
    assert jnp.allclose(loss, ref, rtol=1e-5, atol=1e-5), (loss, ref)
    assert jnp.allclose(loss_auto, ref, rtol=1e-5, atol=1e-5), (loss_auto, ref)

    print("KERNEL_OK")
</pallas_src>

<mosaic_0001>
module attributes {stable_mosaic.version = 11 : i64} {
  func.func @_soft_dice_kernel(%arg0: i32, %arg1: i32, %arg2: memref<1x4x128xf32, #tpu.memory_space<vmem>>, %arg3: memref<1x1x128xf32, #tpu.memory_space<vmem>>, %arg4: memref<1x4x1xf32, #tpu.memory_space<vmem>>, %arg5: memref<4x1xf32, #tpu.memory_space<vmem>>, %arg6: memref<4x1xf32, #tpu.memory_space<vmem>>, %arg7: memref<4x1xf32, #tpu.memory_space<vmem>>) attributes {dimension_semantics = [#tpu.dimension_semantics<parallel>, #tpu.dimension_semantics<arbitrary>], iteration_bounds = array<i64: 2, 2>, scalar_prefetch = 0 : i64, scratch_operands = 3 : i64, tpu.core_type = #tpu.core_type<tc>, window_params = [{transform_indices = @transform_0, window_bounds = array<i64: 1, 4, 128>}, {transform_indices = @transform_1, window_bounds = array<i64: 1, 1, 128>}, {transform_indices = @transform_2, window_bounds = array<i64: 1, 4, 1>}]} {
    %c0_i32 = arith.constant 0 : i32
    %0 = arith.cmpi eq, %arg1, %c0_i32 : i32
    %1 = arith.extui %0 : i1 to i32
    %c0_i32_0 = arith.constant 0 : i32
    %2 = arith.cmpi ne, %1, %c0_i32_0 : i32
    scf.if %2 {
      %cst_22 = arith.constant 0.000000e+00 : f32
      %38 = vector.broadcast %cst_22 : f32 to vector<4x1xf32>
      %c0_23 = arith.constant 0 : index
      %c0_24 = arith.constant 0 : index
      %39 = vector.load %arg5[%c0_23, %c0_24] : memref<4x1xf32, #tpu.memory_space<vmem>>, vector<4x1xf32>
      tpu.vector_store %arg5[%c0_23, %c0_24], %38 {strides = array<i32>} : memref<4x1xf32, #tpu.memory_space<vmem>>, vector<4x1xf32>,
      %cst_25 = arith.constant 0.000000e+00 : f32
      %40 = vector.broadcast %cst_25 : f32 to vector<4x1xf32>
      %c0_26 = arith.constant 0 : index
      %c0_27 = arith.constant 0 : index
      %41 = vector.load %arg6[%c0_26, %c0_27] : memref<4x1xf32, #tpu.memory_space<vmem>>, vector<4x1xf32>
      tpu.vector_store %arg6[%c0_26, %c0_27], %40 {strides = array<i32>} : memref<4x1xf32, #tpu.memory_space<vmem>>, vector<4x1xf32>,
      %cst_28 = arith.constant 0.000000e+00 : f32
      %42 = vector.broadcast %cst_28 : f32 to vector<4x1xf32>
      %c0_29 = arith.constant 0 : index
      %c0_30 = arith.constant 0 : index
      %43 = vector.load %arg7[%c0_29, %c0_30] : memref<4x1xf32, #tpu.memory_space<vmem>>, vector<4x1xf32>
      tpu.vector_store %arg7[%c0_29, %c0_30], %42 {strides = array<i32>} : memref<4x1xf32, #tpu.memory_space<vmem>>, vector<4x1xf32>,
    } else {
    }
    %c0 = arith.constant 0 : index
    %c0_1 = arith.constant 0 : index
    %c0_2 = arith.constant 0 : index
    %3 = vector.load %arg2[%c0, %c0_1, %c0_2] : memref<1x4x128xf32, #tpu.memory_space<vmem>>, vector<1x4x128xf32>
    %4 = vector.shape_cast %3 : vector<1x4x128xf32> to vector<4x128xf32>
    %5 = arith.negf %4 : vector<4x128xf32>
    %6 = math.exp %5 : vector<4x128xf32>
    %cst = arith.constant 1.000000e+00 : f32
    %7 = vector.broadcast %cst : f32 to vector<4x128xf32>
    %8 = arith.addf %7, %6 : vector<4x128xf32>
    %9 = arith.divf %7, %8 : vector<4x128xf32>
    %c0_3 = arith.constant 0 : index
    %c0_4 = arith.constant 0 : index
    %c0_5 = arith.constant 0 : index
    %10 = vector.load %arg3[%c0_3, %c0_4, %c0_5] : memref<1x1x128xf32, #tpu.memory_space<vmem>>, vector<1x1x128xf32>
    %11 = vector.shape_cast %10 : vector<1x1x128xf32> to vector<1x128xf32>
    %12 = vector.shape_cast %11 : vector<1x128xf32> to vector<1x128xf32>
    %13 = vector.broadcast %12 : vector<1x128xf32> to vector<4x128xf32>
    %14 = tpu.iota {dimensions = array<i32: 0>} : vector<4x128xi32>
    %15 = arith.sitofp %14 : vector<4x128xi32> to vector<4x128xf32>
    %16 = arith.cmpf oeq, %13, %15 : vector<4x128xf32>
    %17 = arith.extui %16 : vector<4x128xi1> to vector<4x128xi32>
    %18 = arith.sitofp %17 : vector<4x128xi32> to vector<4x128xf32>
    %c0_6 = arith.constant 0 : index
    %c0_7 = arith.constant 0 : index
    %19 = vector.load %arg5[%c0_6, %c0_7] : memref<4x1xf32, #tpu.memory_space<vmem>>, vector<4x1xf32>
    %20 = arith.mulf %9, %18 : vector<4x128xf32>
    %cst_8 = arith.constant dense<0.000000e+00> : vector<4xf32>
    %21 = vector.multi_reduction <add>, %20, %cst_8 [1] : vector<4x128xf32> to vector<4xf32>
    %22 = vector.shape_cast %21 : vector<4xf32> to vector<4x1xf32>
    %23 = arith.addf %19, %22 : vector<4x1xf32>
    %c0_9 = arith.constant 0 : index
    %c0_10 = arith.constant 0 : index
    %24 = vector.load %arg5[%c0_9, %c0_10] : memref<4x1xf32, #tpu.memory_space<vmem>>, vector<4x1xf32>
    tpu.vector_store %arg5[%c0_9, %c0_10], %23 {strides = array<i32>} : memref<4x1xf32, #tpu.memory_space<vmem>>, vector<4x1xf32>,
    %c0_11 = arith.constant 0 : index
    %c0_12 = arith.constant 0 : index
    %25 = vector.load %arg6[%c0_11, %c0_12] : memref<4x1xf32, #tpu.memory_space<vmem>>, vector<4x1xf32>
    %cst_13 = arith.constant dense<0.000000e+00> : vector<4xf32>
    %26 = vector.multi_reduction <add>, %9, %cst_13 [1] : vector<4x128xf32> to vector<4xf32>
    %27 = vector.shape_cast %26 : vector<4xf32> to vector<4x1xf32>
    %28 = arith.addf %25, %27 : vector<4x1xf32>
    %c0_14 = arith.constant 0 : index
    %c0_15 = arith.constant 0 : index
    %29 = vector.load %arg6[%c0_14, %c0_15] : memref<4x1xf32, #tpu.memory_space<vmem>>, vector<4x1xf32>
    tpu.vector_store %arg6[%c0_14, %c0_15], %28 {strides = array<i32>} : memref<4x1xf32, #tpu.memory_space<vmem>>, vector<4x1xf32>,
    %c0_16 = arith.constant 0 : index
    %c0_17 = arith.constant 0 : index
    %30 = vector.load %arg7[%c0_16, %c0_17] : memref<4x1xf32, #tpu.memory_space<vmem>>, vector<4x1xf32>
    %cst_18 = arith.constant dense<0.000000e+00> : vector<4xf32>
    %31 = vector.multi_reduction <add>, %18, %cst_18 [1] : vector<4x128xf32> to vector<4xf32>
    %32 = vector.shape_cast %31 : vector<4xf32> to vector<4x1xf32>
    %33 = arith.addf %30, %32 : vector<4x1xf32>
    %c0_19 = arith.constant 0 : index
    %c0_20 = arith.constant 0 : index
    %34 = vector.load %arg7[%c0_19, %c0_20] : memref<4x1xf32, #tpu.memory_space<vmem>>, vector<4x1xf32>
    tpu.vector_store %arg7[%c0_19, %c0_20], %33 {strides = array<i32>} : memref<4x1xf32, #tpu.memory_space<vmem>>, vector<4x1xf32>,
    %c1_i32 = arith.constant 1 : i32
    %35 = arith.cmpi eq, %arg1, %c1_i32 : i32
    %36 = arith.extui %35 : i1 to i32
    %c0_i32_21 = arith.constant 0 : i32
    %37 = arith.cmpi ne, %36, %c0_i32_21 : i32
    scf.if %37 {
      %c0_22 = arith.constant 0 : index
      %c0_23 = arith.constant 0 : index
      %38 = vector.load %arg5[%c0_22, %c0_23] : memref<4x1xf32, #tpu.memory_space<vmem>>, vector<4x1xf32>
      %cst_24 = arith.constant 2.000000e+00 : f32
      %39 = vector.broadcast %cst_24 : f32 to vector<4x1xf32>
      %40 = arith.mulf %39, %38 : vector<4x1xf32>
      %cst_25 = arith.constant 9.99999974E-6 : f32
      %41 = vector.broadcast %cst_25 : f32 to vector<4x1xf32>
      %42 = arith.addf %40, %41 : vector<4x1xf32>
      %c0_26 = arith.constant 0 : index
      %c0_27 = arith.constant 0 : index
      %43 = vector.load %arg6[%c0_26, %c0_27] : memref<4x1xf32, #tpu.memory_space<vmem>>, vector<4x1xf32>
      %c0_28 = arith.constant 0 : index
      %c0_29 = arith.constant 0 : index
      %44 = vector.load %arg7[%c0_28, %c0_29] : memref<4x1xf32, #tpu.memory_space<vmem>>, vector<4x1xf32>
      %45 = arith.addf %43, %44 : vector<4x1xf32>
      %cst_30 = arith.constant 9.99999974E-6 : f32
      %46 = vector.broadcast %cst_30 : f32 to vector<4x1xf32>
      %47 = arith.addf %45, %46 : vector<4x1xf32>
      %48 = arith.divf %42, %47 : vector<4x1xf32>
      %c0_31 = arith.constant 0 : index
      %c0_32 = arith.constant 0 : index
      %c0_33 = arith.constant 0 : index
      %49 = vector.load %arg4[%c0_31, %c0_32, %c0_33] : memref<1x4x1xf32, #tpu.memory_space<vmem>>, vector<1x4x1xf32>
      %50 = vector.shape_cast %49 : vector<1x4x1xf32> to vector<4x1xf32>
      %51 = vector.shape_cast %48 : vector<4x1xf32> to vector<1x4x1xf32>
      tpu.vector_store %arg4[%c0_31, %c0_32, %c0_33], %51 {strides = array<i32>} : memref<1x4x1xf32, #tpu.memory_space<vmem>>, vector<1x4x1xf32>,
    } else {
    }
    return
  }
  func.func @transform_0(%arg0: i32, %arg1: i32) -> (i32, i32, i32) {
    %c0_i32 = arith.constant 0 : i32
    %c0_i32_0 = arith.constant 0 : i32
    return %arg0, %c0_i32, %arg1 : i32, i32, i32
  }
  func.func @transform_1(%arg0: i32, %arg1: i32) -> (i32, i32, i32) {
    %c0_i32 = arith.constant 0 : i32
    %c0_i32_0 = arith.constant 0 : i32
    return %arg0, %c0_i32, %arg1 : i32, i32, i32
  }
  func.func @transform_2(%arg0: i32, %arg1: i32) -> (i32, i32, i32) {
    %c0_i32 = arith.constant 0 : i32
    %c0_i32_0 = arith.constant 0 : i32
    %c0_i32_1 = arith.constant 0 : i32
    return %arg0, %c0_i32, %c0_i32_0 : i32, i32, i32
  }
}

</mosaic_0001>

<bundles_post_ra>
// kernel: tpu_custom_call.1
= control target key start
LH: loop header
LB: loop body
LE: loop exit
PB: predicated region body
PF: predicated region fallthrough
CT: control target
= control target key end

     0   :  { %7 = vsyncpa [#allocation6], 0  ;;  %s833_s0 = inlined_call_operand.hbm [shape: f32[2,4,256], index: 0, kind: input, shape index: {}]   ;;  %s834_s1 = inlined_call_operand.hbm [shape: f32[2,1,256], index: 1, kind: input, shape index: {}]   ;;  %s835_s2 = inlined_call_operand.vmem [shape: f32[2,4,1], index: 2, kind: output, shape index: {}]  }
   0x1   :  { %9 = vsyncpa [#allocation6 + $0x1], 0 }
   0x2   :  { %10 = vsyncpa [#allocation8], 0 }
   0x3   :  { %12 = vsyncpa [#allocation8 + $0x1], 0  ;;  %s630_s9 = smov 0   ;;  %s632_s10 = smov 0  }
   0x4   :  { %s634_s11 = smov 0   ;;  %s636_s12 = smov 0  }
   0x5   :  { %s638_s13 = smov 0   ;;  %s640_s14 = smov 0  }
   0x6   :  { %s642_s15 = smov 0   ;;  %s644_s16 = smov 0  }
   0x7 LB: > { %s376_s17 = sadd.s32 4294967295, %s609_s16   ;;  %s27_s18 = sadd.s32 1, %s601_s14  ;;  %s609_s16 = sphi %s644_s16, %s18_s16   ;;  %s605_s15 = sphi %s642_s15, %s851_s15   ;;  %s601_s14 = sphi %s640_s14, %s850_s14   ;;  %s597_s13 = sphi %s638_s13, %s849_s13   ;;  %s593_s12 = sphi %s636_s12, %s848_s12   ;;  %s589_s11 = sphi %s634_s11, %s847_s11   ;;  %s585_s10 = sphi %s632_s10, %s846_s10   ;;  %s581_s9 = sphi %s630_s9, %s845_s9  }
   0x8   : > { %p28_p0 = scmp.ge.s32.totalorder %s27_s18, 2  ;;  %s30_s19 = sadd.s32 1, %s605_s15 }
   0x9   : > { %s39_s20 = sadd.s32 1, %s589_s11  ;;  %p46_p1 = scmp.ne.s32.totalorder %s589_s11, %s585_s10 }
   0xa   : > { %s853_s18 = smov (%p28_p0, %s27_s18), 0  ;;  %s855_s19 = smov (!%p28_p0, %s30_s19), %s605_s15 }
   0xb   : > { %s35_s21 = ssub.s32 %s601_s14, %s853_s18  ;;  %p47_p2 = scmp.eq.s32.totalorder %s609_s16, 0 }
   0xc   : > { %p32_p3 = scmp.ge.s32.totalorder %s855_s19, 2  ;;  %p52_p4 = scmp.ne.s32.totalorder %s585_s10, %s581_s9 }
   0xd   : > { %p681_p5 = por %p47_p2, %p46_p1  ;;  %p53_p6 = scmp.eq.s32.totalorder %s376_s17, 0 }
   0xe   : > { %s857_s19 = smov (%p32_p3, %s855_s19), 0  ;;  %p406_p8 = scmp.lt.s32.totalorder %s609_s16, 4 }
   0xf   : > { %p687_p7 = por %p53_p6, %p52_p4  ;;  %s34_s24 = ssub.s32 %s605_s15, %s857_s19 }
  0x10   : > { %s36_s25 = sor.u32 %s35_s21, %s34_s24  ;;  %s695_s26 = sand.u32 1, %s589_s11  }
  0x11   : > { %s838_s23 = scalar_select %p687_p7, 1, 0 }
  0x12   : > { %p37_p9 = scmp.eq.s32.totalorder %s36_s25, 0  ;;  %s380_s27 = sshll.u32 %s695_s26, 2 }
  0x13   : > { %s381_s28 = sshll.u32 %s605_s15, 1  ;;  %s134_s4 = scalar_lea.vmem [#allocation5], %s380_s27 }
  0x14   : > { %s700_s29 = scalar_select %p37_p9, %s589_s11, %s39_s20  }
  0x15   : > { %s703_s30 = sadd.s32 %s601_s14, %s381_s28  ;;  %s143_s5 = sshll.u32 %s134_s4, 4  ;;  %s711_s5 = int_to_ptr.vmem [resolvable:$true] %s143_s5 }
  0x16   : > { %s382_s3 = sshll.u32 %s703_s30, 6  ;;  %p717_p10 = pnand %p406_p8, %p681_p5 }
  0x17   : > { %s709_s8 = scalar_lea.hbm %s833_s0, %s382_s3  ;;  %s131_s17 = scalar_lea.sflag [#allocation6], %s695_s26 }
  0x18   : > { %s479_s20 = scalar_lea.hbm %s709_s8, 64  ;;  %p481_p0 = pneg %p717_p10 }
  0x19   : > { %p480_p13 = scmp.ne.s32.totalorder %s709_s8, %s479_s20  ;;  %s484_s24 = scalar_lea.hbm %s833_s0, 256 }
  0x1a   : > { %p485_p3 = scmp.lt.u32.totalorder %s709_s8, %s833_s0  ;;  %p486_p4 = scmp.lt.u32.totalorder %s484_s24, %s479_s20 }
  0x1b   : > { %p482_p1 = pnand %p481_p0, %p480_p13  ;;  %p488_p6 = scmp.lt.u32.totalorder %s479_s20, %s709_s8 }
  0x1c   : > { %p487_p5 = por %p486_p4, %p485_p3 }
  0x1d   : > { %p483_p2 = pneg %p482_p1 }
  0x1e   : > { %p489_p8 = por %p488_p6, %p487_p5 }
  0x20   : > { %p490_p9 = pnand %p489_p8, %p483_p2 }
  0x22   : > { %493 = shalt.err (!%p490_p9)
}
  0x23   : > { %s494_s28 = scalar_lea.vmem %s711_s5, 64  ;;  %s611_s3 = smov [#allocation5]  }
  0x24   : > { %p495_p13 = scmp.ne.s32.totalorder %s711_s5, %s494_s28  ;;  %s499_s4 = sshll.u32 %s611_s3, 4  ;;  %s500_s4 = int_to_ptr.vmem [resolvable:$false] %s499_s4 }
  0x25   : > { %s501_s6 = scalar_lea.vmem %s500_s4, 128  ;;  %p502_p12 = scmp.lt.s32.totalorder %s711_s5, %s500_s4 }
  0x26   : > { %p497_p1 = pnand %p495_p13, %p481_p0  ;;  %p503_p3 = scmp.lt.s32.totalorder %s501_s6, %s494_s28 }
  0x28   : > { %p498_p11 = pneg %p497_p1  ;;  %p504_p4 = por %p503_p3, %p502_p12 }
  0x2a   : > { %p505_p5 = pnand %p504_p4, %p498_p11 }
  0x2c   : > { %508 = shalt.err (!%p505_p5)
}
  0x2d   : > { %402 = dma.hbm_to_vmem [thread:$0]  (!%p717_p10), %s709_s8, 64, %s711_s5, %s131_s17  }
  0x2e   : > { %p840_p2 = scmp.lt.s32.totalorder %s609_s16, 5  ;;  %p841_p6 = scmp.ge.s32.totalorder %s609_s16, 1 }
  0x2f   : > { %s384_s20 = sshll.u32 %s703_s30, 4  ;;  %s153_s25 = scalar_lea.vmem [#allocation7], %s695_s26 }
  0x30   : > { %p753_p8 = pnand %p841_p6, %p840_p2  ;;  %s761_s24 = scalar_lea.hbm %s834_s1, %s384_s20 }
  0x31   : > { %s162_s27 = sshll.u32 %s153_s25, 4  ;;  %s151_s5 = scalar_lea.sflag [#allocation8], %s695_s26  ;;  %s163_s27 = int_to_ptr.vmem [resolvable:$true] %s162_s27 }
  0x32   : > { %s842_s7 = scalar_select %p753_p8, 1, 0 }
  0x33   : > { %s509_s8 = scalar_lea.hbm %s761_s24, 16  ;;  %s514_s28 = scalar_lea.hbm %s834_s1, 64 }
  0x34   : > { %p510_p11 = scmp.ne.s32.totalorder %s761_s24, %s509_s8  ;;  %p515_p13 = scmp.lt.u32.totalorder %s761_s24, %s834_s1 }
  0x35   : > { %p516_p1 = scmp.lt.u32.totalorder %s514_s28, %s509_s8  ;;  %p518_p4 = scmp.lt.u32.totalorder %s509_s8, %s761_s24 }
  0x36   : > { %p512_p12 = pnand %p510_p11, %p481_p0 }
  0x37   : > { %p517_p3 = por %p516_p1, %p515_p13 }
  0x38   : > { %p513_p9 = pneg %p512_p12 }
  0x39   : > { %p519_p5 = por %p518_p4, %p517_p3 }
  0x3b   : > { %p520_p2 = pnand %p519_p5, %p513_p9 }
  0x3d   : > { %523 = shalt.err (!%p520_p2)
}
  0x3e   : > { %s524_s26 = scalar_lea.vmem %s163_s27, 16  ;;  %s612_s6 = smov [#allocation7]  }
  0x3f   : > { %p525_p6 = scmp.ne.s32.totalorder %s163_s27, %s524_s26  ;;  %s529_s20 = sshll.u32 %s612_s6, 4  ;;  %s530_s20 = int_to_ptr.vmem [resolvable:$false] %s529_s20 }
  0x40   : > { %s531_s21 = scalar_lea.vmem %s530_s20, 32  ;;  %p532_p7 = scmp.lt.s32.totalorder %s163_s27, %s530_s20 }
  0x41   : > { %p527_p11 = pnand %p525_p6, %p481_p0  ;;  %p533_p8 = scmp.lt.s32.totalorder %s531_s21, %s524_s26 }
  0x43   : > { %p528_p12 = pneg %p527_p11  ;;  %p534_p1 = por %p533_p8, %p532_p7 }
  0x45   : > { %p535_p13 = pnand %p534_p1, %p528_p12 }
  0x47   : > { %538 = shalt.err (!%p535_p13)
}
  0x48   : > { %405 = dma.hbm_to_vmem [thread:$0]  (!%p717_p10), %s761_s24, 16, %s163_s27, %s151_s5  }
  0x49   : > { %p843_p9 = scmp.ne.s32.totalorder %s842_s7, 0 }
  0x4a   : > { %s173_s22 = sand.u32 (!%p843_p9), 1, %s585_s10   ;;  %p844_p0 = scmp.ne.s32.totalorder (!%p843_p9), %s838_s23, 0 }
  0x4b   : > { %171 = sbr.rel (%p843_p9) target bundleno = 298 (0x12a), region = 28  ;;  %s386_s25 = sshll.u32 (!%p843_p9), %s173_s22, 2 }
  0x4c   : > { %s174_s8 = scalar_lea.sflag (!%p843_p9), [#allocation6], %s173_s22  ;;  %s177_s30 = scalar_lea.vmem (!%p843_p9), [#allocation5], %s386_s25 }
  0x52   : > { %572 = dma.done.wait (%p844_p0), %s174_s8, 64  }
  0x53   : > { %574 = vsyncadd (%p844_p0), %s174_s8, 4294967232  ;;  %s183_s17 = scalar_lea.sflag [#allocation8], %s173_s22  ;;  %s185_s28 = scalar_lea.vmem [#allocation7], %s173_s22 }
  0x54   : > { %576 = dma.done.wait (%p844_p0), %s183_s17, 16  }
  0x55   : > { %578 = vsyncadd (%p844_p0), %s183_s17, 4294967280  ;;  %p209_p7 = scmp.lt.s32.totalorder %s597_s13, 1  ;;  %p388_p10 = scmp.ne.s32.totalorder %s593_s12, 0 }
  0x56   : > { %vm217_vm0 = vcmask (!%p388_p10), 3072   ;;  %v613_v0 = vmov (!%p388_p10), 0.0  }
  0x57   : > { %s859_s13 = smov (!%p209_p7, %s597_s13), 1  ;;  %216 = sbr.rel (%p388_p10) target bundleno = 94 (0x5e), region = 40 }
  0x58   : > { %s387_s9 = sshll.u32 %s859_s13, 2  ;;  %218 = vst.msk [vmem:[#allocation2] sm:$0xf] (!%p388_p10), %vm217_vm0, %v613_v0  ;;  %219 = vst.msk [vmem:[#allocation3] sm:$0xf] (!%p388_p10), %vm217_vm0, %v613_v0 }
  0x59   : > { %s800_s27 = scalar_lea.vmem %s835_s2, %s387_s9  ;;  %220 = vst.msk [vmem:[#allocation4] sm:$0xf] (!%p388_p10), %vm217_vm0, %v613_v0 }
  0x5e PF: > { %v221_v1 = vld [vmem:[%s177_s30] sm:$0xf]  ;;  %v235_v2 = vlaneseq  ;;  %v390_v5 = vld [vmem:[%s185_s28] ss:$0 sm:$0xff]  ;;  %v614_v7 = vmov 0.0   ;;  %vm243_vm2 = vcmask 1043456  }
  0x5f   : > { %v389_v3 = vmul.f32 -1.442695, %v221_v1  ;;  %vm248_vm3 = vcmask 3072   ;;  %v241_v19 = vld [vmem:[#allocation2] sm:$0xf]  ;;  %p392_p8 = scmp.ne.s32.totalorder %s593_s12, 1 }
  0x60   : > { %v236_v4 = vshrl.u32 %v235_v2, 7  ;;  %v256_v16 = vld [vmem:[#allocation4] sm:$0xf]  ;;  %v250_v22 = vld [vmem:[#allocation3] sm:$0xf] }
  0x61   : > { %473 = vpow2.f32 %v389_v3 }
  0x62   : > { %v237_v6 = vcvt.s32.f32 %v236_v4 }
  0x64   : > { %vm238_vm1 = vcmp.eq.f32.partialorder %v390_v5, %v237_v6 }
  0x65   : > { %v391_v8 = vsel %vm238_vm1, 1.0, %v614_v7 }
  0x66   : > { %v257_v9 = vsel %vm243_vm2, %v391_v8, 0.0 }
  0x67   : > { %258 = vadd.xlane.f32.xlu1 %v257_v9 }
  0x6b   : > { %v474_v10 = vpop.eup %473 }
  0x6c   : > { %v225_v11 = vadd.f32 1.0, %v474_v10 }
  0x6e   : > { %475 = vrcp.f32 %v225_v11 }
  0x78   : > { %v476_v12 = vpop.eup %475 }
  0x79   : > { %v242_v13 = vmul.f32 %v476_v12, %v391_v8  ;;  %v251_v15 = vsel %vm243_vm2, %v476_v12, 0.0 }
  0x7b   : > { %v244_v14 = vsel %vm243_vm2, %v242_v13, 0.0 }
  0x7c   : > { %245 = vadd.xlane.f32.xlu0 %v244_v14 }
  0x80   : > { %252 = vadd.xlane.f32.xlu0 %v251_v15 }
  0xf4   : > { %v259_v17 = vpop.xlane.xlu1 %258 }
  0xf5   : > { %v260_v18 = vadd.f32 %v259_v17, %v256_v16 }
  0xf7   : > { %261 = vst.msk [vmem:[#allocation4] sm:$0xf] %vm248_vm3, %v260_v18 }
  0xfe   : > { %v270_v26 = vld [vmem:[#allocation4] sm:$0xf] (!%p392_p8) }
 0x109   : > { %v246_v20 = vpop.xlane.xlu0 %245 }
 0x10a   : > { %v247_v21 = vadd.f32 %v246_v20, %v241_v19  ;;  %265 = sbr.rel (%p392_p8) target bundleno = 298 (0x12a), region = 44 }
 0x10c   : > { %249 = vst.msk [vmem:[#allocation2] sm:$0xf] %vm248_vm3, %v247_v21 }
 0x10d   : > { %v253_v23 = vpop.xlane.xlu0 %252 }
 0x10e   : > { %v254_v24 = vadd.f32 %v253_v23, %v250_v22 }
 0x110   : > { %255 = vst.msk [vmem:[#allocation3] sm:$0xf] %vm248_vm3, %v254_v24 }
 0x113   : > { %v266_v29 = vld [vmem:[#allocation2] sm:$0xf] }
 0x114   : > { %v267_v30 = vmul.f32 2.0, %v266_v29 }
 0x116   : > { %v268_v31 = vadd.f32 1e-05, %v267_v30 }
 0x117   : > { %v269_v25 = vld [vmem:[#allocation3] sm:$0xf] }
 0x118   : > { %v271_v27 = vadd.f32 %v270_v26, %v269_v25 }
 0x11a   : > { %v272_v28 = vadd.f32 1e-05, %v271_v27 }
 0x11c   : > { %477 = vrcp.f32 %v272_v28 }
 0x126   : > { %v478_v32 = vpop.eup %477 }
 0x127   : > { %v274_v33 = vmul.f32 %v478_v32, %v268_v31 }
 0x129   : > { %275 = vst.msk [vmem:[%s800_s27] sm:$0xf] %vm248_vm3, %v274_v33 }
 0x12a PF: > { %s18_s16 = sadd.s32 1, %s609_s16   ;;  %s845_s9 = smov %s585_s10 }
 0x12b   : > { %p15_p3 = scmp.ge.s32.totalorder %s18_s16, 6   ;;  %s846_s10 = smov %s589_s11 }
 0x12c   : > { %s847_s11 = smov %s700_s29  ;;  %s848_s12 = smov %s601_s14 }
 0x12d   : > { %s849_s13 = smov %s605_s15  ;;  %s850_s14 = smov %s853_s18 }
 0x12e   : > { %s851_s15 = smov %s857_s19  ;;  %17 = sbr.rel (!%p15_p3) target bundleno = 7 (0x7), region = 89 }
 0x135   :  { %295 = vsyncpa [#allocation6], 1 }
 0x136   :  { %297 = vsyncpa [#allocation6 + $0x1], 1 }
 0x137   :  { %298 = vsyncpa [#allocation8], 1 }
 0x138   :  { %300 = vsyncpa [#allocation8 + $0x1], 1 }

</bundles_post_ra>
